<compile_context>
chip_gen: v5e
topology: v5e:2x2
jax: 0.10.0
libtpu: 0.0.40
codegen_flags: <defaults>
</compile_context>

<pallas_src>
import functools

import jax
import jax.numpy as jnp
from jax.experimental import pallas as pl
from jax.experimental.pallas import tpu as pltpu


# Explicit VMEM budget: comfortably above the ~10 MiB worst-case working set at
# production tiles, below v7x's 64 MiB/TC physical VMEM (with headroom), and
# raises the 16/32 MiB default scoped limit on v5e/v6e.
_VMEM_LIMIT = 48 * 1024 * 1024


def _round_up(x, m):
    return ((x + m - 1) // m) * m


def _choose_tile(t, max_tile=256):
    """Largest time tile <= max_tile that divides t and is a multiple of 8
    (falls back to the full axis if no such divisor exists / t is small)."""
    if t <= max_tile:
        return t
    tt = (max_tile // 8) * 8
    while tt >= 8:
        if t % tt == 0:
            return tt
        tt -= 8
    return t


def _cparams(*sem):
    return pltpu.CompilerParams(dimension_semantics=sem,
                                vmem_limit_bytes=_VMEM_LIMIT)


# ----------------------------------------------------------------------------
# Row-tiled "x @ w + b" kernel (bf16 MXU operands, f32 accumulation).
# ----------------------------------------------------------------------------
def _linear_kernel(x_ref, w_ref, b_ref, o_ref):
    x = x_ref[...].astype(jnp.bfloat16)          # bf16 operands, f32 accumulate
    acc = jnp.dot(x, w_ref[...], preferred_element_type=jnp.float32)
    o_ref[...] = (acc + b_ref[...]).astype(o_ref.dtype)


def linear(x2d, w, b, *, tm=256):
    """x2d: (M, K) @ w: (K, N) + b: (N,) -> (M, N) f32, tiled over rows."""
    M, K = x2d.shape
    N = w.shape[1]
    tm = min(tm, _round_up(M, 8))
    Mp = _round_up(M, tm)
    if Mp != M:
        x2d = jnp.pad(x2d, ((0, Mp - M), (0, 0)))
    out = pl.pallas_call(
        _linear_kernel,
        out_shape=jax.ShapeDtypeStruct((Mp, N), jnp.float32),
        grid=(Mp // tm,),
        in_specs=[
            pl.BlockSpec((tm, K), lambda i: (i, 0)),
            pl.BlockSpec((K, N), lambda i: (0, 0)),
            pl.BlockSpec((1, N), lambda i: (0, 0)),
        ],
        out_specs=pl.BlockSpec((tm, N), lambda i: (i, 0)),
        compiler_params=_cparams("parallel"),
    )(x2d, w.astype(jnp.bfloat16), b.reshape(1, N).astype(jnp.float32))
    return out[:M]


# ----------------------------------------------------------------------------
# Linear time interpolation (align_corners=False), tiled over the output time.
# Per tile: build the sparse 2-tap selection matrix in VMEM, apply on the MXU.
# ----------------------------------------------------------------------------
def _interp_kernel(h_ref, o_ref, *, TT, T_in, T_out):
    j = pl.program_id(1)
    r = float(T_in) / float(T_out)
    o_idx = jax.lax.broadcasted_iota(jnp.int32, (TT, 1), 0) + j * TT
    src = (o_idx.astype(jnp.float32) + 0.5) * r - 0.5
    src = jnp.maximum(src, 0.0)
    i0f = jnp.floor(src)
    i0 = jnp.minimum(i0f.astype(jnp.int32), T_in - 1)
    i1 = jnp.minimum(i0 + 1, T_in - 1)
    w1 = src - i0f
    w0 = 1.0 - w1
    cols = jax.lax.broadcasted_iota(jnp.int32, (TT, T_in), 1)
    sel = jnp.where(cols == i0, w0, 0.0) + jnp.where(cols == i1, w1, 0.0)
    # Interpolation kept in f32 to preserve the exact tap weights.
    o_ref[0] = jnp.dot(sel, h_ref[0],
                       preferred_element_type=jnp.float32).astype(o_ref.dtype)


def interp_time(h, t_out, *, max_tile=256):
    """F.interpolate(mode='linear', align_corners=False) along time, (B,T,H)."""
    B, t_in, H = h.shape
    TT = _choose_tile(t_out, max_tile)
    kernel = functools.partial(_interp_kernel, TT=TT, T_in=t_in, T_out=t_out)
    return pl.pallas_call(
        kernel,
        out_shape=jax.ShapeDtypeStruct((B, t_out, H), jnp.float32),
        grid=(B, t_out // TT),
        in_specs=[pl.BlockSpec((1, t_in, H), lambda b, j: (b, 0, 0))],
        out_specs=pl.BlockSpec((1, TT, H), lambda b, j: (b, j, 0)),
        compiler_params=_cparams("parallel", "parallel"),
    )(h)


# ----------------------------------------------------------------------------
# Fused ConvNeXt block, tiled over (batch, time) with per-tile halos.
# Optionally fuses the final output projection (lane-padded) into the block.
# ----------------------------------------------------------------------------
def _convnext_kernel(xc_ref, hl_ref, hr_ref, dww_ref, dwb_ref, g_ref, be_ref,
                     w1_ref, b1_ref, w2_ref, b2_ref, *rest, TT, K, fuse_out):
    if fuse_out:
        wo_ref, bo_ref, o_ref, win_ref = rest
    else:
        o_ref, win_ref = rest
    pad = K // 2
    xc = xc_ref[0]                                   # (TT, H) residual / centre

    # Halo'd window [prev_tail ; cur ; next_head] assembled in VMEM scratch.
    win_ref[0:pad, :] = hl_ref[...]
    win_ref[pad:pad + TT, :] = xc
    win_ref[pad + TT:pad + TT + pad, :] = hr_ref[...]

    # Depthwise Conv1d (groups=H, padding='same'); bias added once after taps.
    dww = dww_ref[...]                               # (K, H)
    acc = xc * dww[pad]                              # centre tap, aligned
    for k in range(K):                               # static unroll
        if k == pad:
            continue
        acc = acc + win_ref[k:k + TT, :] * dww[k]
    acc = acc + dwb_ref[...]

    # LayerNorm over channels (biased variance, eps=1e-5, affine).
    mean = jnp.mean(acc, axis=-1, keepdims=True)
    var = jnp.mean((acc - mean) ** 2, axis=-1, keepdims=True)
    xn = (acc - mean) * jax.lax.rsqrt(var + 1e-5) * g_ref[...] + be_ref[...]

    # Pointwise MLP: Linear -> exact GELU(erf) -> Linear (bf16 MXU, f32 accum).
    h = jnp.dot(xn.astype(jnp.bfloat16), w1_ref[...],
                preferred_element_type=jnp.float32) + b1_ref[...]
    h = 0.5 * h * (1.0 + jax.lax.erf(h * 0.7071067811865476))
    y = jnp.dot(h.astype(jnp.bfloat16), w2_ref[...],
                preferred_element_type=jnp.float32) + b2_ref[...]
    out = xc + y                                     # residual add

    if fuse_out:                                     # fused output projection
        o_ref[0] = (jnp.dot(out.astype(jnp.bfloat16), wo_ref[...],
                            preferred_element_type=jnp.float32)
                    + bo_ref[...]).astype(o_ref.dtype)
    else:
        o_ref[0] = out.astype(o_ref.dtype)


def convnext_block(x, p, out_proj=None, *, kernel_size=7, max_tile=256):
    """x: (B, T, H) -> (B, T, H), or (B, T, Npad) when out_proj=(wo, bo) fused."""
    B, T, H = x.shape
    K = kernel_size
    pad = K // 2
    TT = _choose_tile(T, max_tile)
    nT = T // TT
    Hx = p["w1"].shape[1]

    # Per-tile halos (pad rows from each neighbour tile; zeros at the sequence
    # ends).  Replaces the per-block jnp.pad of the whole sequence: traffic is
    # only O(B * nT * pad * H) instead of an extra full read+write pass.
    xr = x.reshape(B, nT, TT, H)
    zpad = jnp.zeros((B, 1, pad, H), x.dtype)
    halo_l = jnp.concatenate([zpad, xr[:, :-1, TT - pad:, :]], axis=1)
    halo_r = jnp.concatenate([xr[:, 1:, :pad, :], zpad], axis=1)

    fuse_out = out_proj is not None
    const = lambda shape: pl.BlockSpec(shape, lambda b, t: (0,) * len(shape))
    in_specs = [
        pl.BlockSpec((1, TT, H), lambda b, t: (b, t, 0)),                # x tile
        pl.BlockSpec((None, None, pad, H), lambda b, t: (b, t, 0, 0)),   # left halo
        pl.BlockSpec((None, None, pad, H), lambda b, t: (b, t, 0, 0)),   # right halo
        const((K, H)), const((1, H)), const((1, H)), const((1, H)),      # dw/ln params
        const((H, Hx)), const((1, Hx)), const((Hx, H)), const((1, H)),   # MLP params
    ]
    args = [x, halo_l, halo_r, p["dw_w"], p["dw_b"], p["ln_g"], p["ln_b"],
            p["w1"].astype(jnp.bfloat16), p["b1"],
            p["w2"].astype(jnp.bfloat16), p["b2"]]
    if fuse_out:
        wo, bo = out_proj
        Npad = wo.shape[1]
        in_specs += [const((H, Npad)), const((1, Npad))]
        args += [wo, bo]
        out_c = Npad
    else:
        out_c = H

    kernel = functools.partial(_convnext_kernel, TT=TT, K=K, fuse_out=fuse_out)
    return pl.pallas_call(
        kernel,
        out_shape=jax.ShapeDtypeStruct((B, T, out_c), jnp.float32),
        grid=(B, nT),
        in_specs=in_specs,
        out_specs=pl.BlockSpec((1, TT, out_c), lambda b, t: (b, t, 0)),
        scratch_shapes=[pltpu.VMEM((TT + 2 * pad, H), jnp.float32)],
        compiler_params=_cparams("parallel", "parallel"),
    )(*args)


# ----------------------------------------------------------------------------
# VocoderHead forward.
# ----------------------------------------------------------------------------
def vocoder_head(x, params, upsample_factor, target_len=None):
    """x: (B, T, input_dim) -> (B, T_out, output_dim)."""
    B, T, D = x.shape
    H = params["in_w"].shape[1]
    Dout = params["out_w"].shape[1]

    # 1) input projection (row-tiled linear).
    h = linear(x.reshape(B * T, D), params["in_w"], params["in_b"]).reshape(B, T, H)

    # 2) time upsampling (linear, align_corners=False), channels-last, no transposes.
    t_out = target_len if target_len is not None else T * upsample_factor
    h = interp_time(h, t_out)

    # 3) ConvNeXt blocks; the output projection is fused into the last block.
    #    Mel bins padded up to a multiple of 128 lanes for unmasked stores;
    #    the real Dout is sliced outside.
    Npad = _round_up(max(Dout, 1), 128)
    wo = jnp.pad(params["out_w"], ((0, 0), (0, Npad - Dout))).astype(jnp.bfloat16)
    bo = jnp.pad(params["out_b"], (0, Npad - Dout)).reshape(1, Npad)

    blocks = params["blocks"]
    if not blocks:
        out = linear(h.reshape(B * t_out, H), params["out_w"], params["out_b"])
        return out.reshape(B, t_out, Dout)
    for p in blocks[:-1]:
        h = convnext_block(h, p)
    out = convnext_block(h, blocks[-1], out_proj=(wo, bo))
    return out[:, :, :Dout]


# ----------------------------------------------------------------------------
# Deterministic synthetic parameter init (shapes follow the PyTorch module).
# ----------------------------------------------------------------------------
def init_params(key, input_dim, output_dim, hidden_dim, n_blocks,
                kernel_size=7, expand_ratio=2):
    def nrm(k, shape, scale=0.02):
        return scale * jax.random.normal(k, shape, dtype=jnp.float32)

    keys = jax.random.split(key, 4 + n_blocks)
    params = {
        "in_w": nrm(keys[0], (input_dim, hidden_dim)),
        "in_b": nrm(keys[1], (hidden_dim,)),
        "out_w": nrm(keys[2], (hidden_dim, output_dim)),
        "out_b": nrm(keys[3], (output_dim,)),
        "blocks": [],
    }
    hx = hidden_dim * expand_ratio
    for i in range(n_blocks):
        bk = jax.random.split(keys[4 + i], 8)
        params["blocks"].append({
            "dw_w": nrm(bk[0], (kernel_size, hidden_dim)),   # torch (C,1,K) -> (K,C)
            "dw_b": nrm(bk[1], (1, hidden_dim)),
            "ln_g": jnp.ones((1, hidden_dim), jnp.float32),
            "ln_b": jnp.zeros((1, hidden_dim), jnp.float32),
            "w1": nrm(bk[2], (hidden_dim, hx)),
            "b1": nrm(bk[3], (1, hx)),
            "w2": nrm(bk[4], (hx, hidden_dim)),
            "b2": nrm(bk[5], (1, hidden_dim)),
        })
    return params


if __name__ == "__main__":
    # Small shapes: batch=2, seq=8, input_dim=32, hidden=32, mel bins=16, x2 upsample.
    B, T = 2, 8
    input_dim, output_dim, hidden_dim = 32, 16, 32
    n_blocks, upsample_factor = 2, 2

    key = jax.random.PRNGKey(0)
    kx, kp = jax.random.split(key)
    x = jax.random.normal(kx, (B, T, input_dim), dtype=jnp.float32)
    params = init_params(kp, input_dim, output_dim, hidden_dim, n_blocks)

    out = vocoder_head(x, params, upsample_factor)
    out = jax.block_until_ready(out)
    assert out.shape == (B, T * upsample_factor, output_dim), out.shape
    assert jnp.all(jnp.isfinite(out))
    print("KERNEL_OK")
</pallas_src>

<mosaic_0001>
module attributes {stable_mosaic.version = 11 : i64} {
  func.func @_linear_kernel(%arg0: i32, %arg1: memref<16x32xf32, #tpu.memory_space<vmem>>, %arg2: memref<32x32xbf16, #tpu.memory_space<vmem>>, %arg3: memref<1x32xf32, #tpu.memory_space<vmem>>, %arg4: memref<16x32xf32, #tpu.memory_space<vmem>>) attributes {dimension_semantics = [#tpu.dimension_semantics<parallel>], iteration_bounds = array<i64: 1>, scalar_prefetch = 0 : i64, scratch_operands = 0 : i64, tpu.core_type = #tpu.core_type<tc>, window_params = [{transform_indices = @transform_0, window_bounds = array<i64: 16, 32>}, {pipeline_mode = #tpu.pipeline_mode<synchronous>, transform_indices = @transform_1, window_bounds = array<i64: 32, 32>}, {pipeline_mode = #tpu.pipeline_mode<synchronous>, transform_indices = @transform_2, window_bounds = array<i64: 1, 32>}, {transform_indices = @transform_3, window_bounds = array<i64: 16, 32>}]} {
    %c0 = arith.constant 0 : index
    %c0_0 = arith.constant 0 : index
    %0 = vector.load %arg1[%c0, %c0_0] : memref<16x32xf32, #tpu.memory_space<vmem>>, vector<16x32xf32>
    %1 = arith.truncf %0 : vector<16x32xf32> to vector<16x32xbf16>
    %c0_1 = arith.constant 0 : index
    %c0_2 = arith.constant 0 : index
    %2 = vector.load %arg2[%c0_1, %c0_2] : memref<32x32xbf16, #tpu.memory_space<vmem>>, vector<32x32xbf16>
    %cst = arith.constant dense<0.000000e+00> : vector<16x32xf32>
    %3 = tpu.matmul %1, %2, %cst {dimension_numbers = #tpu.dot_dimension_numbers<[1], [0], [0], [1], [0, 0, 1, 1], [], []>} : vector<16x32xbf16>, vector<32x32xbf16>, vector<16x32xf32> -> vector<16x32xf32>
    %c0_3 = arith.constant 0 : index
    %c0_4 = arith.constant 0 : index
    %4 = vector.load %arg3[%c0_3, %c0_4] : memref<1x32xf32, #tpu.memory_space<vmem>>, vector<1x32xf32>
    %5 = vector.broadcast %4 : vector<1x32xf32> to vector<16x32xf32>
    %6 = arith.addf %3, %5 : vector<16x32xf32>
    %c0_5 = arith.constant 0 : index
    %c0_6 = arith.constant 0 : index
    %7 = vector.load %arg4[%c0_5, %c0_6] : memref<16x32xf32, #tpu.memory_space<vmem>>, vector<16x32xf32>
    tpu.vector_store %arg4[%c0_5, %c0_6], %6 {strides = array<i32>} : memref<16x32xf32, #tpu.memory_space<vmem>>, vector<16x32xf32>,
    return
  }
  func.func @transform_0(%arg0: i32) -> (i32, i32) {
    %c0_i32 = arith.constant 0 : i32
    %c0_i32_0 = arith.constant 0 : i32
    return %arg0, %c0_i32 : i32, i32
  }
  func.func @transform_1(%arg0: i32) -> (i32, i32) {
    %c0_i32 = arith.constant 0 : i32
    %c0_i32_0 = arith.constant 0 : i32
    %c0_i32_1 = arith.constant 0 : i32
    return %c0_i32, %c0_i32_0 : i32, i32
  }
  func.func @transform_2(%arg0: i32) -> (i32, i32) {
    %c0_i32 = arith.constant 0 : i32
    %c0_i32_0 = arith.constant 0 : i32
    %c0_i32_1 = arith.constant 0 : i32
    return %c0_i32, %c0_i32_0 : i32, i32
  }
  func.func @transform_3(%arg0: i32) -> (i32, i32) {
    %c0_i32 = arith.constant 0 : i32
    %c0_i32_0 = arith.constant 0 : i32
    return %arg0, %c0_i32 : i32, i32
  }
}

</mosaic_0001>

<bundles_post_ra>
// kernel: tpu_custom_call.1
= control target key start
LH: loop header
LB: loop body
LE: loop exit
PB: predicated region body
PF: predicated region fallthrough
CT: control target
= control target key end

     0   :  { %8 = vsyncpa [#allocation3], 0  ;;  %s253_s0 = inlined_call_operand.hbm [shape: f32[16,32], index: 0, kind: input, shape index: {}]   ;;  %s254_s1 = inlined_call_operand.hbm [shape: bf16[32,32], index: 1, kind: input, shape index: {}]   ;;  %s255_s2 = inlined_call_operand.vmem [shape: f32[1,32], index: 2, kind: input, shape index: {}]   ;;  %s256_s3 = inlined_call_operand.hbm [shape: f32[16,32], index: 3, kind: output, shape index: {}]  }
   0x1   :  { %9 = vsyncpa [#allocation6], 0 }
   0x2   :  { %10 = vsyncpa [#allocation4], 0  ;;  %s15_s14 = sshll.u32 %s253_s0, 4  ;;  %s208_s15 = smov [#allocation2]   ;;  %s16_s14 = int_to_ptr.hbm [resolvable:$true] %s15_s14 }
   0x3   :  { %s17_s16 = sshll.u32 %s208_s15, 4  ;;  %s28_s19 = sshll.u32 %s254_s1, 4  ;;  %s18_s16 = int_to_ptr.vmem [resolvable:$true] %s17_s16  ;;  %s29_s19 = int_to_ptr.hbm [resolvable:$true] %s28_s19 }
   0x4   :  { %s209_s20 = smov 128   ;;  %s210_s21 = smov 8  }
   0x5   :  { %23 = dma.hbm_to_vmem [thread:$0]  %s16_s14, 256, %s18_s16, [#allocation3], %s209_s20, %s209_s20, %s210_s21  }
   0x6   :  { %s211_s22 = smov [#allocation5]   ;;  %s212_s24 = smov 64  }
   0x7   :  { %s30_s23 = sshll.u32 %s211_s22, 4  ;;  %s213_s0 = smov 4   ;;  %s31_s23 = int_to_ptr.vmem [resolvable:$true] %s30_s23 }
   0x8   :  { %36 = dma.hbm_to_vmem [thread:$0]  %s29_s19, 256, %s31_s23, [#allocation6], %s212_s24, %s212_s24, %s213_s0  }
   0x9   :  { %202 = dma.done.wait [#allocation3], 256  }
   0xa   :  { %203 = vsyncadd [#allocation3], 4294967040 }
   0xb   :  { %204 = dma.done.wait [#allocation6], 256  }
   0xc   :  { %205 = vsyncadd [#allocation6], 4294967040  ;;  %v121_v0 = vld [vmem:[#allocation5 + $0x8] sm:$0xff]  ;;  %v120_v1 = vld [vmem:[#allocation5] sm:$0xff]  ;;  %vm71_vm0 = vcmask 261120   ;;  %s214_s26 = smov [#allocation7]  }
   0xd   :  { %81 = vmatpush.bf16.msra.mxu0 %v121_v0  ;;  %v48_v2 = vld [vmem:[#allocation2] sm:$0xff]  ;;  %v49_v3 = vld [vmem:[#allocation2 + $0x8] sm:$0xff]  ;;  %s95_s27 = sshll.u32 %s214_s26, 4  ;;  %s97_s30 = sshll.u32 %s256_s3, 4  ;;  %s96_s27 = int_to_ptr.vmem [resolvable:$true] %s95_s27  ;;  %s98_s30 = int_to_ptr.hbm [resolvable:$true] %s97_s30 }
   0xe   :  { %v50_v4 = vpack.c.bf16 %v49_v3, %v48_v2  ;;  %v129_v5 = vld [vmem:[%s255_s2] ss:$0 sm:$0xff] }
  0x11   :  { %82 = vmatpush.bf16.msra.mxu0 %v120_v1 }
  0x14   :  { %119 = vmatmul.msk.bf16.vlgmr.msra.gmra.mxu0 %vm71_vm0, %v50_v4 }
  0x91   :  { %v84_v6 = vpop.f32.mrf.mxu0 }
  0x92   :  { %v85_v7 = vadd.f32 %v129_v5, %v84_v6 }
  0x94   :  { %89 = vst.msk [vmem:[#allocation7] sm:$0xff] %vm71_vm0, %v85_v7 }
  0x99   :  { %v86_v8 = vpop.f32.mrf.mxu0 }
  0x9a   :  { %v87_v9 = vadd.f32 %v129_v5, %v86_v8 }
  0x9c   :  { %90 = vst.msk [vmem:[#allocation7 + $0x8] sm:$0xff] %vm71_vm0, %v87_v9 }
  0x9d   :  { %103 = dma.vmem_to_hbm [thread:$0]  %s96_s27, 256, %s98_s30, [#allocation4], %s209_s20, %s209_s20, %s210_s21  }
  0x9e   :  { %206 = dma.done.wait [#allocation4], 256  }
  0x9f   :  { %207 = vsyncadd [#allocation4], 4294967040 }
  0xa0   :  { %108 = vsyncpa [#allocation3], 1 }
  0xa1   :  { %109 = vsyncpa [#allocation6], 1 }
  0xa2   :  { %110 = vsyncpa [#allocation4], 1 }

</bundles_post_ra>
